<compile_context>
chip_gen: v5e
topology: v5e:2x2
jax: 0.10.0
libtpu: 0.0.40
codegen_flags: <defaults>
</compile_context>

<pallas_src>
import jax
import jax.numpy as jnp
from jax import lax
from jax.experimental import pallas as pl
from jax.experimental.pallas import tpu as pltpu

_SUB = 8      # sublanes per vreg
_LANE = 128   # lanes per vreg


def _pick_chunk_rows(s_rows, c_in, max_live_vregs=40):
    """Largest multiple-of-8 divisor of s_rows keeping (c_in+1) live chunk tiles
    within the vreg budget (bounds live ranges -> no spills at large tiles)."""
    if s_rows % _SUB != 0:
        return s_rows                      # tiny full-dim tile (e.g. 2 rows)
    cap_rows = max(_SUB, (max_live_vregs // (c_in + 1)) * _SUB)
    best = _SUB
    c = _SUB
    while c <= min(cap_rows, s_rows):
        if s_rows % c == 0:
            best = c
        c += _SUB
    return best


def _outconv_kernel(x_ref, w_ref, b_ref, o_ref):
    """tanh(W @ x + b) for one (batch, pixel-tile) grid cell.

    x_ref : (C_in,  S, 128) f32 VMEM   -- dense (sublane, lane) pixel tiles
    w_ref : (C_out, C_in)   f32 SMEM   -- resident scalars
    b_ref : (C_out,)        f32 SMEM
    o_ref : (C_out, S, 128) f32 VMEM
    """
    c_in, s_rows, _ = x_ref.shape
    c_out = o_ref.shape[0]
    chunk = _pick_chunk_rows(s_rows, c_in)
    n_chunks = s_rows // chunk

    def do_chunk(r):
        # Load each input-channel chunk exactly once; reuse for all C_out.
        xs = [x_ref[ci, pl.ds(r, chunk), :] for ci in range(c_in)]
        for co in range(c_out):                       # unrolled VPU MACs
            acc = xs[0] * w_ref[co, 0]
            for ci in range(1, c_in):
                acc = acc + xs[ci] * w_ref[co, ci]
            # Full-width (chunk,128) store; tanh goes to the EUP slot.
            o_ref[co, pl.ds(r, chunk), :] = jnp.tanh(acc + b_ref[co]).astype(o_ref.dtype)

    if n_chunks == 1:
        do_chunk(0)
    else:
        def body(i, carry):
            do_chunk(pl.multiple_of(i * chunk, chunk))
            return carry
        lax.fori_loop(0, n_chunks, body, 0)


def outconv_forward(x_nchw, weight, bias, *, tile_pixels=65536):
    """1x1 Conv2d + Tanh, NCHW in / NCHW out.

    x_nchw : (N, C_in, H, W) float32
    weight : (C_out, C_in, 1, 1) float32  (PyTorch conv weight layout)
    bias   : (C_out,) float32
    returns: (N, C_out, H, W) float32
    """
    N, C_in, H, W = x_nchw.shape
    C_out = weight.shape[0]
    HW = H * W

    rows = pl.cdiv(HW, _LANE)                 # sublane rows per channel image
    target_rows = max(_SUB, tile_pixels // _LANE)

    # v7x megacore: keep grid product N*nt >= 2 when the image is big enough.
    min_nt = 2 if (N == 1 and rows >= 2 * _SUB) else 1
    nt = max(pl.cdiv(rows, target_rows), min_nt)
    if nt == 1:
        S = rows                              # single full-dim tile
    else:
        S = pl.cdiv(pl.cdiv(rows, nt), _SUB) * _SUB    # multiple of 8 sublanes
        nt = pl.cdiv(rows, S)
    rows_pad = nt * S
    HW_pad = rows_pad * _LANE

    x3 = x_nchw.reshape(N, C_in, HW)
    if HW_pad != HW:
        # TODO(synk): mask the ragged tail in-kernel (pltpu.store mask /
        # pl.BoundedSlice) to avoid this extra HBM pass when H*W % 128 != 0.
        x3 = jnp.pad(x3, ((0, 0), (0, 0), (0, HW_pad - HW)))
    # Free reshape: pixels become dense (sublane, lane) = (rows_pad, 128) tiles.
    x4 = x3.reshape(N, C_in, rows_pad, _LANE)

    w2 = weight.reshape(C_out, C_in)          # tiny -> resident SMEM scalars
    b1 = bias.reshape(C_out)

    out4 = pl.pallas_call(
        _outconv_kernel,
        out_shape=jax.ShapeDtypeStruct((N, C_out, rows_pad, _LANE), x_nchw.dtype),
        grid_spec=pltpu.PrefetchScalarGridSpec(
            num_scalar_prefetch=0,
            grid=(N, nt),
            in_specs=[
                pl.BlockSpec((pl.Squeezed(), C_in, S, _LANE),
                             lambda n, t: (n, 0, t, 0)),
                pl.BlockSpec(memory_space=pltpu.MemorySpace.SMEM),
                pl.BlockSpec(memory_space=pltpu.MemorySpace.SMEM),
            ],
            out_specs=pl.BlockSpec((pl.Squeezed(), C_out, S, _LANE),
                                   lambda n, t: (n, 0, t, 0)),
        ),
        compiler_params=pltpu.CompilerParams(
            dimension_semantics=("parallel", "parallel")),
    )(x4, w2, b1)

    out3 = out4.reshape(N, C_out, HW_pad)
    if HW_pad != HW:
        out3 = out3[:, :, :HW]
    return out3.reshape(N, C_out, H, W)


def _reference(x, weight, bias):
    C_out, C_in = weight.shape[0], weight.shape[1]
    w_mat = weight.reshape(C_out, C_in)
    return jnp.tanh(
        jnp.einsum("nchw,oc->nohw", x, w_mat,
                   precision=jax.lax.Precision.HIGHEST)
        + bias[None, :, None, None])


def _check(name, x, weight, bias, **kw):
    y = outconv_forward(x, weight, bias, **kw)
    jax.block_until_ready(y)
    y_ref = _reference(x, weight, bias)
    assert y.shape == y_ref.shape, (name, y.shape, y_ref.shape)
    err = float(jnp.max(jnp.abs(y - y_ref)))
    assert err < 1e-4, (name, err)


if __name__ == "__main__":
    key = jax.random.PRNGKey(0)
    kx, kw, kb, kx2, kx3 = jax.random.split(key, 5)

    # Module-consistent small shapes: batch=2, in_channels=4, out_channels=3.
    N, C_in, C_out, H, W = 2, 4, 3, 16, 16
    fan_in = C_in * 1 * 1
    bound = 1.0 / (fan_in ** 0.5)
    weight = jax.random.uniform(kw, (C_out, C_in, 1, 1), jnp.float32, -bound, bound)
    bias = jax.random.uniform(kb, (C_out,), jnp.float32, -bound, bound)

    # (a) spec shape: 16x16 (H*W lane-aligned, single tile per image).
    x = jax.random.normal(kx, (N, C_in, H, W), dtype=jnp.float32)
    _check("16x16", x, weight, bias)

    # (b) non-128-aligned H*W exercises the padded-tail path.
    x2 = jax.random.normal(kx2, (N, C_in, 15, 15), dtype=jnp.float32)
    _check("15x15", x2, weight, bias)

    # (c) N=1, larger spatial with a small tile_pixels exercises the multi-tile
    #     grid split (megacore path) and the in-kernel chunked fori_loop.
    x3 = jax.random.normal(kx3, (1, C_in, 192, 192), dtype=jnp.float32)
    _check("192x192", x3, weight, bias, tile_pixels=16384)

    print("KERNEL_OK")
</pallas_src>

<mosaic_0001>
module attributes {stable_mosaic.version = 11 : i64} {
  func.func @_outconv_kernel(%arg0: i32, %arg1: i32, %arg2: memref<1x4x2x128xf32, #tpu.memory_space<vmem>>, %arg3: memref<3x4xf32, #tpu.memory_space<smem>>, %arg4: memref<3xf32, #tpu.memory_space<smem>>, %arg5: memref<1x3x2x128xf32, #tpu.memory_space<vmem>>) attributes {dimension_semantics = [#tpu.dimension_semantics<parallel>, #tpu.dimension_semantics<parallel>], iteration_bounds = array<i64: 2, 1>, scalar_prefetch = 0 : i64, scratch_operands = 0 : i64, tpu.core_type = #tpu.core_type<tc>, window_params = [{transform_indices = @transform_0, window_bounds = array<i64: 1, 4, 2, 128>}, {transform_indices = @transform_1, window_bounds = array<i64: 3, 4>}, {transform_indices = @transform_2, window_bounds = array<i64: 3>}, {transform_indices = @transform_3, window_bounds = array<i64: 1, 3, 2, 128>}]} {
    %c0 = arith.constant 0 : index
    %c0_0 = arith.constant 0 : index
    %c0_1 = arith.constant 0 : index
    %c0_2 = arith.constant 0 : index
    %0 = vector.load %arg2[%c0, %c0_0, %c0_1, %c0_2] : memref<1x4x2x128xf32, #tpu.memory_space<vmem>>, vector<1x1x2x128xf32>
    %1 = vector.shape_cast %0 : vector<1x1x2x128xf32> to vector<2x128xf32>
    %c0_3 = arith.constant 0 : index
    %c1 = arith.constant 1 : index
    %c0_4 = arith.constant 0 : index
    %c0_5 = arith.constant 0 : index
    %2 = vector.load %arg2[%c0_3, %c1, %c0_4, %c0_5] : memref<1x4x2x128xf32, #tpu.memory_space<vmem>>, vector<1x1x2x128xf32>
    %3 = vector.shape_cast %2 : vector<1x1x2x128xf32> to vector<2x128xf32>
    %c0_6 = arith.constant 0 : index
    %c2 = arith.constant 2 : index
    %c0_7 = arith.constant 0 : index
    %c0_8 = arith.constant 0 : index
    %4 = vector.load %arg2[%c0_6, %c2, %c0_7, %c0_8] : memref<1x4x2x128xf32, #tpu.memory_space<vmem>>, vector<1x1x2x128xf32>
    %5 = vector.shape_cast %4 : vector<1x1x2x128xf32> to vector<2x128xf32>
    %c0_9 = arith.constant 0 : index
    %c3 = arith.constant 3 : index
    %c0_10 = arith.constant 0 : index
    %c0_11 = arith.constant 0 : index
    %6 = vector.load %arg2[%c0_9, %c3, %c0_10, %c0_11] : memref<1x4x2x128xf32, #tpu.memory_space<vmem>>, vector<1x1x2x128xf32>
    %7 = vector.shape_cast %6 : vector<1x1x2x128xf32> to vector<2x128xf32>
    %c0_12 = arith.constant 0 : index
    %c0_13 = arith.constant 0 : index
    %8 = memref.load %arg3[%c0_12, %c0_13] : memref<3x4xf32, #tpu.memory_space<smem>>
    %9 = vector.broadcast %8 : f32 to vector<2x128xf32>
    %10 = arith.mulf %1, %9 : vector<2x128xf32>
    %c0_14 = arith.constant 0 : index
    %c1_15 = arith.constant 1 : index
    %11 = memref.load %arg3[%c0_14, %c1_15] : memref<3x4xf32, #tpu.memory_space<smem>>
    %12 = vector.broadcast %11 : f32 to vector<2x128xf32>
    %13 = arith.mulf %3, %12 : vector<2x128xf32>
    %14 = arith.addf %10, %13 : vector<2x128xf32>
    %c0_16 = arith.constant 0 : index
    %c2_17 = arith.constant 2 : index
    %15 = memref.load %arg3[%c0_16, %c2_17] : memref<3x4xf32, #tpu.memory_space<smem>>
    %16 = vector.broadcast %15 : f32 to vector<2x128xf32>
    %17 = arith.mulf %5, %16 : vector<2x128xf32>
    %18 = arith.addf %14, %17 : vector<2x128xf32>
    %c0_18 = arith.constant 0 : index
    %c3_19 = arith.constant 3 : index
    %19 = memref.load %arg3[%c0_18, %c3_19] : memref<3x4xf32, #tpu.memory_space<smem>>
    %20 = vector.broadcast %19 : f32 to vector<2x128xf32>
    %21 = arith.mulf %7, %20 : vector<2x128xf32>
    %22 = arith.addf %18, %21 : vector<2x128xf32>
    %c0_20 = arith.constant 0 : index
    %23 = memref.load %arg4[%c0_20] : memref<3xf32, #tpu.memory_space<smem>>
    %24 = vector.broadcast %23 : f32 to vector<2x128xf32>
    %25 = arith.addf %22, %24 : vector<2x128xf32>
    %26 = math.tanh %25 : vector<2x128xf32>
    %c0_21 = arith.constant 0 : index
    %c0_22 = arith.constant 0 : index
    %c0_23 = arith.constant 0 : index
    %c0_24 = arith.constant 0 : index
    %27 = vector.load %arg5[%c0_21, %c0_22, %c0_23, %c0_24] : memref<1x3x2x128xf32, #tpu.memory_space<vmem>>, vector<1x1x2x128xf32>
    %28 = vector.shape_cast %27 : vector<1x1x2x128xf32> to vector<2x128xf32>
    %29 = vector.shape_cast %26 : vector<2x128xf32> to vector<1x1x2x128xf32>
    tpu.vector_store %arg5[%c0_21, %c0_22, %c0_23, %c0_24], %29 {strides = array<i32>} : memref<1x3x2x128xf32, #tpu.memory_space<vmem>>, vector<1x1x2x128xf32>,
    %c1_25 = arith.constant 1 : index
    %c0_26 = arith.constant 0 : index
    %30 = memref.load %arg3[%c1_25, %c0_26] : memref<3x4xf32, #tpu.memory_space<smem>>
    %31 = vector.broadcast %30 : f32 to vector<2x128xf32>
    %32 = arith.mulf %1, %31 : vector<2x128xf32>
    %c1_27 = arith.constant 1 : index
    %c1_28 = arith.constant 1 : index
    %33 = memref.load %arg3[%c1_27, %c1_28] : memref<3x4xf32, #tpu.memory_space<smem>>
    %34 = vector.broadcast %33 : f32 to vector<2x128xf32>
    %35 = arith.mulf %3, %34 : vector<2x128xf32>
    %36 = arith.addf %32, %35 : vector<2x128xf32>
    %c1_29 = arith.constant 1 : index
    %c2_30 = arith.constant 2 : index
    %37 = memref.load %arg3[%c1_29, %c2_30] : memref<3x4xf32, #tpu.memory_space<smem>>
    %38 = vector.broadcast %37 : f32 to vector<2x128xf32>
    %39 = arith.mulf %5, %38 : vector<2x128xf32>
    %40 = arith.addf %36, %39 : vector<2x128xf32>
    %c1_31 = arith.constant 1 : index
    %c3_32 = arith.constant 3 : index
    %41 = memref.load %arg3[%c1_31, %c3_32] : memref<3x4xf32, #tpu.memory_space<smem>>
    %42 = vector.broadcast %41 : f32 to vector<2x128xf32>
    %43 = arith.mulf %7, %42 : vector<2x128xf32>
    %44 = arith.addf %40, %43 : vector<2x128xf32>
    %c1_33 = arith.constant 1 : index
    %45 = memref.load %arg4[%c1_33] : memref<3xf32, #tpu.memory_space<smem>>
    %46 = vector.broadcast %45 : f32 to vector<2x128xf32>
    %47 = arith.addf %44, %46 : vector<2x128xf32>
    %48 = math.tanh %47 : vector<2x128xf32>
    %c0_34 = arith.constant 0 : index
    %c1_35 = arith.constant 1 : index
    %c0_36 = arith.constant 0 : index
    %c0_37 = arith.constant 0 : index
    %49 = vector.load %arg5[%c0_34, %c1_35, %c0_36, %c0_37] : memref<1x3x2x128xf32, #tpu.memory_space<vmem>>, vector<1x1x2x128xf32>
    %50 = vector.shape_cast %49 : vector<1x1x2x128xf32> to vector<2x128xf32>
    %51 = vector.shape_cast %48 : vector<2x128xf32> to vector<1x1x2x128xf32>
    tpu.vector_store %arg5[%c0_34, %c1_35, %c0_36, %c0_37], %51 {strides = array<i32>} : memref<1x3x2x128xf32, #tpu.memory_space<vmem>>, vector<1x1x2x128xf32>,
    %c2_38 = arith.constant 2 : index
    %c0_39 = arith.constant 0 : index
    %52 = memref.load %arg3[%c2_38, %c0_39] : memref<3x4xf32, #tpu.memory_space<smem>>
    %53 = vector.broadcast %52 : f32 to vector<2x128xf32>
    %54 = arith.mulf %1, %53 : vector<2x128xf32>
    %c2_40 = arith.constant 2 : index
    %c1_41 = arith.constant 1 : index
    %55 = memref.load %arg3[%c2_40, %c1_41] : memref<3x4xf32, #tpu.memory_space<smem>>
    %56 = vector.broadcast %55 : f32 to vector<2x128xf32>
    %57 = arith.mulf %3, %56 : vector<2x128xf32>
    %58 = arith.addf %54, %57 : vector<2x128xf32>
    %c2_42 = arith.constant 2 : index
    %c2_43 = arith.constant 2 : index
    %59 = memref.load %arg3[%c2_42, %c2_43] : memref<3x4xf32, #tpu.memory_space<smem>>
    %60 = vector.broadcast %59 : f32 to vector<2x128xf32>
    %61 = arith.mulf %5, %60 : vector<2x128xf32>
    %62 = arith.addf %58, %61 : vector<2x128xf32>
    %c2_44 = arith.constant 2 : index
    %c3_45 = arith.constant 3 : index
    %63 = memref.load %arg3[%c2_44, %c3_45] : memref<3x4xf32, #tpu.memory_space<smem>>
    %64 = vector.broadcast %63 : f32 to vector<2x128xf32>
    %65 = arith.mulf %7, %64 : vector<2x128xf32>
    %66 = arith.addf %62, %65 : vector<2x128xf32>
    %c2_46 = arith.constant 2 : index
    %67 = memref.load %arg4[%c2_46] : memref<3xf32, #tpu.memory_space<smem>>
    %68 = vector.broadcast %67 : f32 to vector<2x128xf32>
    %69 = arith.addf %66, %68 : vector<2x128xf32>
    %70 = math.tanh %69 : vector<2x128xf32>
    %c0_47 = arith.constant 0 : index
    %c2_48 = arith.constant 2 : index
    %c0_49 = arith.constant 0 : index
    %c0_50 = arith.constant 0 : index
    %71 = vector.load %arg5[%c0_47, %c2_48, %c0_49, %c0_50] : memref<1x3x2x128xf32, #tpu.memory_space<vmem>>, vector<1x1x2x128xf32>
    %72 = vector.shape_cast %71 : vector<1x1x2x128xf32> to vector<2x128xf32>
    %73 = vector.shape_cast %70 : vector<2x128xf32> to vector<1x1x2x128xf32>
    tpu.vector_store %arg5[%c0_47, %c2_48, %c0_49, %c0_50], %73 {strides = array<i32>} : memref<1x3x2x128xf32, #tpu.memory_space<vmem>>, vector<1x1x2x128xf32>,
    return
  }
  func.func @transform_0(%arg0: i32, %arg1: i32) -> (i32, i32, i32, i32) {
    %c0_i32 = arith.constant 0 : i32
    %c0_i32_0 = arith.constant 0 : i32
    %c0_i32_1 = arith.constant 0 : i32
    return %arg0, %c0_i32, %arg1, %c0_i32_0 : i32, i32, i32, i32
  }
  func.func @transform_1(%arg0: i32, %arg1: i32) -> (i32, i32) {
    %c0_i32 = arith.constant 0 : i32
    %c0_i32_0 = arith.constant 0 : i32
    %c0_i32_1 = arith.constant 0 : i32
    return %c0_i32, %c0_i32_0 : i32, i32
  }
  func.func @transform_2(%arg0: i32, %arg1: i32) -> i32 {
    %c0_i32 = arith.constant 0 : i32
    %c0_i32_0 = arith.constant 0 : i32
    return %c0_i32 : i32
  }
  func.func @transform_3(%arg0: i32, %arg1: i32) -> (i32, i32, i32, i32) {
    %c0_i32 = arith.constant 0 : i32
    %c0_i32_0 = arith.constant 0 : i32
    %c0_i32_1 = arith.constant 0 : i32
    return %arg0, %c0_i32, %arg1, %c0_i32_0 : i32, i32, i32, i32
  }
}

</mosaic_0001>

<bundles_post_ra>
// kernel: tpu_custom_call.1
= control target key start
LH: loop header
LB: loop body
LE: loop exit
PB: predicated region body
PF: predicated region fallthrough
CT: control target
= control target key end

     0   :  { %s903_s0 = inlined_call_operand.hbm [shape: f32[2,4,2,128], index: 0, kind: input, shape index: {}]   ;;  %s904_s1 = inlined_call_operand.hbm [shape: f32[3,4], index: 1, kind: input, shape index: {}]   ;;  %s905_s2 = inlined_call_operand.vmem [shape: f32[3], index: 2, kind: input, shape index: {}]   ;;  %s906_s3 = inlined_call_operand.hbm [shape: f32[2,3,2,128], index: 3, kind: output, shape index: {}]  }
   0x1   :  { %907 = sst [smem:[#allocation14_spill]] %s904_s1 }
   0x2   :  { %8 = vsyncpa [#allocation3], 0 }
   0x3   :  { %10 = vsyncpa [#allocation3 + $0x1], 0 }
   0x4   :  { %11 = vsyncpa [#allocation5], 0 }
   0x5   :  { %12 = vsyncpa [#allocation6], 0 }
   0x6   :  { %13 = vsyncpa [#allocation4], 0 }
   0x7   :  { %15 = vsyncpa [#allocation4 + $0x1], 0  ;;  %s738_s12 = smov 0   ;;  %s740_s13 = smov 0  }
   0x8   :  { %s742_s14 = smov 0   ;;  %s744_s15 = smov 0  }
   0x9   :  { %s746_s16 = smov 0   ;;  %s748_s17 = smov 0  }
   0xa LB: > { %s430_s18 = sadd.s32 4294967295, %s710_s17   ;;  %s431_s19 = sadd.s32 4294967294, %s710_s17   ;;  %s710_s17 = sphi %s748_s17, %s21_s17   ;;  %s706_s16 = sphi %s746_s16, %s920_s16   ;;  %s702_s15 = sphi %s744_s15, %s919_s15   ;;  %s698_s14 = sphi %s742_s14, %s918_s14   ;;  %s694_s13 = sphi %s740_s13, %s917_s13   ;;  %s690_s12 = sphi %s738_s12, %s916_s12  }
   0xb   : > { %s42_s20 = sadd.s32 1, %s698_s14  ;;  %p49_p0 = scmp.ne.s32.totalorder %s698_s14, %s694_s13 }
   0xc   : > { %p50_p1 = scmp.eq.s32.totalorder %s710_s17, 0  ;;  %p55_p2 = scmp.ne.s32.totalorder %s694_s13, %s690_s12 }
   0xd   : > { %p776_p3 = scmp.eq.s32.totalorder %s430_s18, 0  ;;  %p123_p4 = scmp.eq.s32.totalorder %s430_s18, 1 }
   0xe   : > { %p780_p5 = por %p50_p1, %p49_p0  ;;  %p129_p6 = scmp.eq.s32.totalorder %s431_s19, 1 }
   0xf   : > { %p786_p7 = por %p776_p3, %p55_p2  ;;  %p790_p8 = por %p123_p4, %p49_p0 }
  0x10   : > { %p794_p9 = por %p129_p6, %p55_p2  ;;  %p432_p10 = scmp.ge.s32.totalorder %s710_s17, 1 }
  0x11   : > { %p136_p11 = scmp.lt.s32.totalorder %s710_s17, 3  ;;  %s913_s1 = sld [smem:[#allocation14_spill]] }
  0x12   : > { %p435_p13 = scmp.ge.s32.totalorder %s710_s17, 2  ;;  %p496_p0 = scmp.lt.s32.totalorder %s710_s17, 2 }
  0x13   : > { %p803_p12 = pnand %p432_p10, %p136_p11  ;;  %s158_s5 = sshll.u32 %s905_s2, 4  ;;  %s159_s5 = int_to_ptr.vmem [resolvable:$true] %s158_s5 }
  0x14   : > { %p816_p2 = pnand %p496_p0, %p780_p5  ;;  %s712_s7 = smov [#allocation7]  }
  0x15   : > { %p479_p1 = pneg %p803_p12  ;;  %s713_s8 = smov [#allocation8]  }
  0x16   : > { %s33_s9 = sadd.s32 1, %s706_s16  ;;  %s169_s10 = sand.u32 1, %s698_s14  }
  0x17   : > { %s148_s28 = sshll.u32 %s913_s1, 4  ;;  %p480_p4 = pnand %p479_p1, %p776_p3  ;;  %s149_s28 = int_to_ptr.hbm [resolvable:$true] %s148_s28 }
  0x18   : > { %p35_p6 = scmp.ge.s32.totalorder %s33_s9, 2  ;;  %s436_s11 = sshll.u32 %s169_s10, 3 }
  0x19   : > { %482 = dma.hbm_to_smem (!%p480_p4), %s149_s28, 64, %s712_s7, [#allocation5]  }
  0x1a   : > { %485 = dma.vmem_to_smem (!%p480_p4), %s159_s5, 16, %s713_s8, [#allocation6]  }
  0x1b   : > { %s464_s18 = sshll.u32 %s706_s16, 3  ;;  %s922_s9 = smov (%p35_p6, %s33_s9), 0 }
  0x1c   : > { %s179_s26 = scalar_lea.hbm %s903_s0, %s464_s18  ;;  %s37_s27 = ssub.s32 %s706_s16, %s922_s9 }
  0x1d   : > { %s180_s30 = sshll.u32 %s179_s26, 4  ;;  %p40_p5 = scmp.eq.s32.totalorder %s37_s27, 0  ;;  %s181_s30 = int_to_ptr.hbm [resolvable:$true] %s180_s30 }
  0x1e   : > { %s173_s28 = scalar_lea.vmem [#allocation2], %s436_s11  ;;  %s170_s7 = scalar_lea.sflag [#allocation3], %s169_s10 }
  0x1f   : > { %s182_s4 = sshll.u32 %s173_s28, 4  ;;  %s714_s8 = smov 32   ;;  %s183_s4 = int_to_ptr.vmem [resolvable:$true] %s182_s4 }
  0x20   : > { %s835_s5 = scalar_select %p40_p5, %s698_s14, %s42_s20  }
  0x21   : > { %s715_s1 = smov 2   ;;  %194 = sbr.rel (%p803_p12) target bundleno = 84 (0x54), region = 32 }
  0x22   : > { %489 = dma.hbm_to_vmem [thread:$0]  (!%p816_p2), %s181_s30, 128, %s183_s4, %s170_s7, %s714_s8, %s714_s8, %s715_s1  }
  0x23   : > { %s842_s18 = sand.u32 (!%p803_p12), 1, %s694_s13  }
  0x24   : > { %s440_s11 = sshll.u32 (!%p803_p12), %s842_s18, 3  ;;  %s197_s19 = scalar_lea.sflag (!%p803_p12), [#allocation3], %s842_s18 }
  0x25   : > { %s200_s22 = scalar_lea.vmem (!%p803_p12), [#allocation2], %s440_s11 }
  0x26   : > { %673 = dma.done.wait (%p786_p7), %s197_s19, 128  }
  0x27   : > { %675 = vsyncadd (%p786_p7), %s197_s19, 4294967168 }
  0x28   : > { %677 = dma.done.wait (%p776_p3), [#allocation5], 64  }
  0x29   : > { %679 = vsyncadd (%p776_p3), [#allocation5], 4294967232 }
  0x2a   : > { %681 = dma.done.wait (%p776_p3), [#allocation6], 16  }
  0x2b   : > { %683 = vsyncadd (%p776_p3), [#allocation6], 4294967280 }
  0x2c   : > { %216 = sfence }
  0x2d   : > { %s242_s1 = sld [smem:[#allocation7]]  ;;  %v235_v0 = vld [vmem:[%s200_s22] sm:$0x3]  ;;  %v443_v1 = vld [vmem:[%s200_s22 + $0x2] sm:$0x3]  ;;  %s465_s19 = smul.u32 6, %s842_s18 }
  0x2e   : > { %s446_s20 = sld [smem:[#allocation7 + $0x1]]  ;;  %v444_v2 = vld [vmem:[%s200_s22 + $0x4] sm:$0x3]  ;;  %v445_v4 = vld [vmem:[%s200_s22 + $0x6] sm:$0x3]  ;;  %s466_s22 = smul.u32 6, %s702_s15 }
  0x2f   : > { %s447_s29 = sld [smem:[#allocation7 + $0x2]]  ;;  %s305_s15 = scalar_lea.sflag [#allocation4], %s842_s18 }
  0x30   : > { %s448_s6 = sld [smem:[#allocation7 + $0x3]] }
  0x31   : > { %s858_s23 = sld [smem:[#allocation8]] }
  0x32   : > { %s449_s10 = sld [smem:[#allocation7 + $0x80]] }
  0x33   : > { %v243_v3 = vstv %s242_s1  ;;  %s450_s26 = sld [smem:[#allocation7 + $0x81]]  ;;  %s234_s1 = scalar_lea.vmem [#allocation9], %s465_s19 }
  0x34   : > { %v244_v5 = vmul.f32 %v243_v3, %v235_v0  ;;  %v246_v6 = vstv %s446_s20  ;;  %s451_s27 = sld [smem:[#allocation7 + $0x82]] }
  0x35   : > { %v247_v7 = vmul.f32 %v443_v1, %v246_v6  ;;  %v250_v8 = vstv %s447_s29  ;;  %s452_s21 = sld [smem:[#allocation7 + $0x83]] }
  0x36   : > { %v251_v9 = vmul.f32 %v444_v2, %v250_v8  ;;  %v254_v10 = vstv %s448_s6  ;;  %s860_s30 = sld [smem:[#allocation8 + $0x1]]  ;;  %s317_s6 = scalar_lea.hbm %s906_s3, %s466_s22 }
  0x37   : > { %v248_v11 = vadd.f32 %v247_v7, %v244_v5  ;;  %v255_v12 = vmul.f32 %v445_v4, %v254_v10  ;;  %s455_s28 = sld [smem:[#allocation7 + $0x100]]  ;;  %v258_v17 = vstv %s858_s23  ;;  %s318_s23 = sshll.u32 %s234_s1, 4  ;;  %s319_s23 = int_to_ptr.vmem [resolvable:$true] %s318_s23 }
  0x38   : > { %v263_v13 = vstv %s449_s10  ;;  %s456_s4 = sld [smem:[#allocation7 + $0x101]]  ;;  %s320_s10 = sshll.u32 %s317_s6, 4  ;;  %s321_s10 = int_to_ptr.hbm [resolvable:$true] %s320_s10 }
  0x39   : > { %v252_v14 = vadd.f32 %v251_v9, %v248_v11  ;;  %v264_v15 = vmul.f32 %v263_v13, %v235_v0  ;;  %v266_v16 = vstv %s450_s26  ;;  %s457_s7 = sld [smem:[#allocation7 + $0x102]]  ;;  %s634_s26 = sshra.s32 %s321_s10, 4  ;;  %s635_s26 = int_to_ptr.hbm [resolvable:$true] %s634_s26 }
  0x3a   : > { %v267_v18 = vmul.f32 %v443_v1, %v266_v16  ;;  %v270_v19 = vstv %s451_s27  ;;  %s458_s8 = sld [smem:[#allocation7 + $0x103]]  ;;  %s636_s27 = scalar_lea.hbm %s635_s26, 6 }
  0x3b   : > { %v256_v20 = vadd.f32 %v255_v12, %v252_v14  ;;  %v271_v21 = vmul.f32 %v444_v2, %v270_v19  ;;  %v274_v22 = vstv %s452_s21  ;;  %s459_s11 = sld [smem:[#allocation8 + $0x2]]  ;;  %p637_p3 = scmp.ne.s32.totalorder %s635_s26, %s636_s27 }
  0x3c   : > { %v268_v23 = vadd.f32 %v267_v18, %v264_v15  ;;  %v275_v24 = vmul.f32 %v445_v4, %v274_v22  ;;  %v278_v30 = vstv %s860_s30  ;;  %p641_p11 = scmp.lt.s32.totalorder %s635_s26, %s906_s3 }
  0x3d   : > { %v259_v25 = vadd.f32 %v258_v17, %v256_v20  ;;  %v284_v26 = vstv %s455_s28  ;;  %p638_p7 = pnand %p637_p3, %p790_p8  ;;  %s640_s28 = scalar_lea.hbm %s906_s3, 12 }
  0x3e   : > { %v272_v27 = vadd.f32 %v271_v21, %v268_v23  ;;  %v285_v28 = vmul.f32 %v284_v26, %v235_v0  ;;  %v287_v29 = vstv %s456_s4  ;;  %p642_p12 = scmp.lt.s32.totalorder %s640_s28, %s636_s27 }
  0x3f   : > { %554 = vtanh.f32 %v259_v25  ;;  %v288_v31 = vmul.f32 %v443_v1, %v287_v29  ;;  %v291_v32 = vstv %s457_s7  ;;  %p639_p10 = pneg %p638_p7 }
  0x40   : > { %v276_v33 = vadd.f32 %v275_v24, %v272_v27  ;;  %v292_v34 = vmul.f32 %v444_v2, %v291_v32  ;;  %v295_v35 = vstv %s458_s8  ;;  %p643_p0 = por %p642_p12, %p641_p11 }
  0x41   : > { %v289_v36 = vadd.f32 %v288_v31, %v285_v28  ;;  %v296_v37 = vmul.f32 %v445_v4, %v295_v35  ;;  %v299_v40 = vstv %s459_s11 }
  0x42   : > { %v279_v38 = vadd.f32 %v278_v30, %v276_v33  ;;  %p644_p1 = pnand %p643_p0, %p639_p10 }
  0x43   : > { %v293_v39 = vadd.f32 %v292_v34, %v289_v36 }
  0x44   : > { %556 = vtanh.f32 %v279_v38 }
  0x45   : > { %v555_v41 = vpop.eup %554  ;;  %v297_v42 = vadd.f32 %v296_v37, %v293_v39 }
  0x46   : > { %261 = vst [vmem:[%s234_s1] sm:$0x3] %v555_v41 }
  0x47   : > { %v300_v43 = vadd.f32 %v299_v40, %v297_v42 }
  0x49   : > { %558 = vtanh.f32 %v300_v43 }
  0x4a   : > { %v557_v44 = vpop.eup %556 }
  0x4b   : > { %454 = vst [vmem:[%s234_s1 + $0x2] sm:$0x3] %v557_v44 }
  0x4f   : > { %v559_v45 = vpop.eup %558 }
  0x50   : > { %460 = vst [vmem:[%s234_s1 + $0x4] sm:$0x3] %v559_v45 }
  0x51   : > { %647 = shalt.err (!%p644_p1)
}
  0x52   : > { %s716_s18 = smov 32   ;;  %s717_s8 = smov 2  }
  0x53   : > { %477 = dma.vmem_to_hbm [thread:$0]  (%p790_p8), %s319_s23, 96, %s321_s10, %s305_s15, %s716_s18, %s716_s18, %s717_s8  }
  0x54 PF: > { %s335_s11 = sand.u32 1, %s690_s12   ;;  %p491_p2 = pnand %p435_p13, %p794_p9 }
  0x55   : > { %s336_s19 = scalar_lea.sflag [#allocation4], %s335_s11 }
  0x56   : > { %p492_p4 = pneg %p491_p2 }
  0x58   : > { %685 = dma.done.wait (%p492_p4), %s336_s19, 96  }
  0x59   : > { %687 = vsyncadd (%p492_p4), %s336_s19, 4294967200  ;;  %s21_s17 = sadd.s32 1, %s710_s17   ;;  %s916_s12 = smov %s694_s13 }
  0x5a   : > { %p18_p6 = scmp.ge.s32.totalorder %s21_s17, 4   ;;  %s917_s13 = smov %s698_s14 }
  0x5b   : > { %s918_s14 = smov %s835_s5  ;;  %s919_s15 = smov %s706_s16 }
  0x5c   : > { %s920_s16 = smov %s922_s9  ;;  %20 = sbr.rel (!%p18_p6) target bundleno = 10 (0xa), region = 92 }
  0x61   :  { %342 = vsyncpa [#allocation3], 1 }
  0x62   :  { %344 = vsyncpa [#allocation3 + $0x1], 1 }
  0x63   :  { %345 = vsyncpa [#allocation4], 1 }
  0x64   :  { %347 = vsyncpa [#allocation4 + $0x1], 1 }
  0x65   :  { %348 = vsyncpa [#allocation5], 1 }
  0x66   :  { %350 = vsyncpa [#allocation5 + $0x1], 1 }
  0x67   :  { %351 = vsyncpa [#allocation6], 1 }
  0x68   :  { %353 = vsyncpa [#allocation6 + $0x1], 1 }

</bundles_post_ra>
